<compile_context>
chip_gen: v5e
topology: v5e:2x2
jax: 0.10.0
libtpu: 0.0.40
codegen_flags: <defaults>
</compile_context>

<pallas_src>
import functools

import jax
import jax.numpy as jnp
from jax.experimental import pallas as pl
from jax.experimental.pallas import tpu as pltpu


def logreg_kernel(w_ref, b_ref, x_ref, o_ref):
    # w_ref: (1, F) SMEM, b_ref: (1, 1) SMEM,
    # x_ref: (F, TILE_R, 128) VMEM, o_ref: (TILE_R, 128) VMEM.
    f = x_ref.shape[0]
    z = w_ref[0, 0] * x_ref[0]                  # (TILE_R, 128) dense vregs
    for k in range(1, f):                       # static unroll (F == 2)
        z = z + w_ref[0, k] * x_ref[k]
    z = z + b_ref[0, 0]
    # Exact sigmoid with a single EUP transcendental: sigmoid(z) = 0.5*tanh(z/2) + 0.5.
    o_ref[...] = (0.5 * jnp.tanh(0.5 * z) + 0.5).astype(o_ref.dtype)


def _round_up(x, m):
    return ((x + m - 1) // m) * m


@functools.partial(jax.jit, static_argnames=("max_tile_rows",))
def logistic_regression(x, w, b, *, max_tile_rows=2048):
    """x: (N, F) f32, w: (1, F) f32, b: (1,) f32. Returns sigmoid(x @ w.T + b): (N, 1)."""
    n, f = x.shape

    # Stage feature-major, lane-dense: pad batch to a multiple of 8*128 only (waste
    # capped at 1023 rows), then one fused pad+transpose copy and a FREE contiguous
    # reshape to (F, R, 128). (Accepting x feature-major upstream would remove even
    # this single staging copy.)
    n_pad = _round_up(n, 8 * 128)
    r = n_pad // 128
    xt = jnp.pad(x, ((0, n_pad - n), (0, 0))).T.reshape(f, r, 128)   # (F, R, 128)

    # Large tiles amortize per-grid-step overhead; keep >= 2 grid steps for large N
    # so the "parallel" axis can be sharded across both v7x TensorCores.
    tile_rows = min(max_tile_rows, max(8, _round_up(pl.cdiv(r, 2), 8)))
    grid = (pl.cdiv(r, tile_rows),)

    out = pl.pallas_call(
        logreg_kernel,
        out_shape=jax.ShapeDtypeStruct((r, 128), jnp.float32),
        grid=grid,
        in_specs=[
            pl.BlockSpec(memory_space=pltpu.MemorySpace.SMEM),        # w (1, F) scalars
            pl.BlockSpec(memory_space=pltpu.MemorySpace.SMEM),        # b (1, 1) scalar
            pl.BlockSpec((f, tile_rows, 128), lambda i: (0, i, 0)),   # x^T tile, dense
        ],
        out_specs=pl.BlockSpec((tile_rows, 128), lambda i: (i, 0)),   # lane-dense out
        compiler_params=pltpu.CompilerParams(
            dimension_semantics=("parallel",),                        # 2-TC shard on v7x
        ),
    )(w, b.reshape(1, 1), xt)

    out_flat = out.reshape(n_pad)
    if n == n_pad:                     # skip the slice copy when there is no padding
        return out_flat.reshape(n, 1)
    return out_flat[:n].reshape(n, 1)


if __name__ == "__main__":
    key = jax.random.PRNGKey(0)
    kx, kw, kb = jax.random.split(key, 3)

    # nn.Linear(2, 1): 2 input features, 1 output; batch of 8 points.
    N, F = 8, 2
    x = jax.random.normal(kx, (N, F), dtype=jnp.float32)

    # Mimic PyTorch's U(-1/sqrt(fan_in), 1/sqrt(fan_in)) init, deterministically.
    bound = 1.0 / jnp.sqrt(jnp.float32(F))
    w = jax.random.uniform(kw, (1, F), minval=-bound, maxval=bound, dtype=jnp.float32)
    b = jax.random.uniform(kb, (1,), minval=-bound, maxval=bound, dtype=jnp.float32)

    out = jax.block_until_ready(logistic_regression(x, w, b))

    # Reference check in plain JAX (exact sigmoid in-kernel -> tight tolerance).
    ref = jax.nn.sigmoid(x @ w.T + b)
    assert out.shape == (N, 1), out.shape
    assert jnp.allclose(out, ref, atol=1e-5), (out, ref)

    print("KERNEL_OK")
</pallas_src>

<mosaic_0001>
module attributes {stable_mosaic.version = 11 : i64} {
  func.func @logreg_kernel(%arg0: i32, %arg1: memref<1x2xf32, #tpu.memory_space<smem>>, %arg2: memref<1x1xf32, #tpu.memory_space<smem>>, %arg3: memref<2x8x128xf32, #tpu.memory_space<vmem>>, %arg4: memref<8x128xf32, #tpu.memory_space<vmem>>) attributes {dimension_semantics = [#tpu.dimension_semantics<parallel>], iteration_bounds = array<i64: 1>, scalar_prefetch = 0 : i64, scratch_operands = 0 : i64, tpu.core_type = #tpu.core_type<tc>, window_params = [{transform_indices = @transform_0, window_bounds = array<i64: 1, 2>}, {transform_indices = @transform_1, window_bounds = array<i64: 1, 1>}, {transform_indices = @transform_2, window_bounds = array<i64: 2, 8, 128>}, {transform_indices = @transform_3, window_bounds = array<i64: 8, 128>}]} {
    %c0 = arith.constant 0 : index
    %c0_0 = arith.constant 0 : index
    %0 = memref.load %arg1[%c0, %c0_0] : memref<1x2xf32, #tpu.memory_space<smem>>
    %c0_1 = arith.constant 0 : index
    %c0_2 = arith.constant 0 : index
    %c0_3 = arith.constant 0 : index
    %1 = vector.load %arg3[%c0_1, %c0_2, %c0_3] : memref<2x8x128xf32, #tpu.memory_space<vmem>>, vector<1x8x128xf32>
    %2 = vector.shape_cast %1 : vector<1x8x128xf32> to vector<8x128xf32>
    %3 = vector.broadcast %0 : f32 to vector<8x128xf32>
    %4 = arith.mulf %3, %2 : vector<8x128xf32>
    %c0_4 = arith.constant 0 : index
    %c1 = arith.constant 1 : index
    %5 = memref.load %arg1[%c0_4, %c1] : memref<1x2xf32, #tpu.memory_space<smem>>
    %c1_5 = arith.constant 1 : index
    %c0_6 = arith.constant 0 : index
    %c0_7 = arith.constant 0 : index
    %6 = vector.load %arg3[%c1_5, %c0_6, %c0_7] : memref<2x8x128xf32, #tpu.memory_space<vmem>>, vector<1x8x128xf32>
    %7 = vector.shape_cast %6 : vector<1x8x128xf32> to vector<8x128xf32>
    %8 = vector.broadcast %5 : f32 to vector<8x128xf32>
    %9 = arith.mulf %8, %7 : vector<8x128xf32>
    %10 = arith.addf %4, %9 : vector<8x128xf32>
    %c0_8 = arith.constant 0 : index
    %c0_9 = arith.constant 0 : index
    %11 = memref.load %arg2[%c0_8, %c0_9] : memref<1x1xf32, #tpu.memory_space<smem>>
    %12 = vector.broadcast %11 : f32 to vector<8x128xf32>
    %13 = arith.addf %10, %12 : vector<8x128xf32>
    %cst = arith.constant 5.000000e-01 : f32
    %14 = vector.broadcast %cst : f32 to vector<8x128xf32>
    %15 = arith.mulf %14, %13 : vector<8x128xf32>
    %16 = math.tanh %15 : vector<8x128xf32>
    %cst_10 = arith.constant 5.000000e-01 : f32
    %17 = vector.broadcast %cst_10 : f32 to vector<8x128xf32>
    %18 = arith.mulf %17, %16 : vector<8x128xf32>
    %cst_11 = arith.constant 5.000000e-01 : f32
    %19 = vector.broadcast %cst_11 : f32 to vector<8x128xf32>
    %20 = arith.addf %18, %19 : vector<8x128xf32>
    %c0_12 = arith.constant 0 : index
    %c0_13 = arith.constant 0 : index
    %21 = vector.load %arg4[%c0_12, %c0_13] : memref<8x128xf32, #tpu.memory_space<vmem>>, vector<8x128xf32>
    tpu.vector_store %arg4[%c0_12, %c0_13], %20 {strides = array<i32>} : memref<8x128xf32, #tpu.memory_space<vmem>>, vector<8x128xf32>,
    return
  }
  func.func @transform_0(%arg0: i32) -> (i32, i32) {
    %c0_i32 = arith.constant 0 : i32
    %c0_i32_0 = arith.constant 0 : i32
    %c0_i32_1 = arith.constant 0 : i32
    return %c0_i32, %c0_i32_0 : i32, i32
  }
  func.func @transform_1(%arg0: i32) -> (i32, i32) {
    %c0_i32 = arith.constant 0 : i32
    %c0_i32_0 = arith.constant 0 : i32
    %c0_i32_1 = arith.constant 0 : i32
    return %c0_i32, %c0_i32_0 : i32, i32
  }
  func.func @transform_2(%arg0: i32) -> (i32, i32, i32) {
    %c0_i32 = arith.constant 0 : i32
    %c0_i32_0 = arith.constant 0 : i32
    %c0_i32_1 = arith.constant 0 : i32
    return %c0_i32, %arg0, %c0_i32_0 : i32, i32, i32
  }
  func.func @transform_3(%arg0: i32) -> (i32, i32) {
    %c0_i32 = arith.constant 0 : i32
    %c0_i32_0 = arith.constant 0 : i32
    return %arg0, %c0_i32 : i32, i32
  }
}

</mosaic_0001>

<bundles_post_ra>
// kernel: logistic_regression.1
= control target key start
LH: loop header
LB: loop body
LE: loop exit
PB: predicated region body
PF: predicated region fallthrough
CT: control target
= control target key end

     0   :  { %9 = vsyncpa [#allocation4], 0  ;;  %s70_s15 = smov [#allocation3]   ;;  %s106_s0 = inlined_call_operand.vmem [shape: f32[1,2], index: 0, kind: input, shape index: {}]   ;;  %s107_s1 = inlined_call_operand.<no memory space> [shape: f32[1,1], index: 1, kind: input, shape index: {}]   ;;  %s108_s2 = inlined_call_operand.vmem [shape: f32[2,8,128], index: 2, kind: input, shape index: {}]   ;;  %s109_s3 = inlined_call_operand.vmem [shape: f32[8,128], index: 3, kind: output, shape index: {}]  }
   0x1   :  { %s15_s14 = sshll.u32 %s106_s0, 4  ;;  %s16_s14 = int_to_ptr.vmem [resolvable:$true] %s15_s14 }
   0x2   :  { %18 = dma.vmem_to_smem %s16_s14, 16, %s70_s15, [#allocation4]  }
   0x3   :  { %68 = dma.done.wait [#allocation4], 16  }
   0x4   :  { %69 = vsyncadd [#allocation4], 4294967280 }
   0x5   :  { %27 = sfence }
   0x6   :  { %s28_s16 = sld [smem:[#allocation3]]  ;;  %v29_v0 = vld [vmem:[%s108_s2] sm:$0xff]  ;;  %v52_v1 = vld [vmem:[%s108_s2 + $0x8] sm:$0xff]  ;;  %v39_v6 = vstv %s107_s1 }
   0x7   :  { %s51_s17 = sld [smem:[#allocation3 + $0x1]] }
   0xc   :  { %v30_v2 = vstv %s28_s16 }
   0xd   :  { %v31_v3 = vmul.f32 %v30_v2, %v29_v0  ;;  %v35_v4 = vstv %s51_s17 }
   0xe   :  { %v36_v5 = vmul.f32 %v52_v1, %v35_v4 }
  0x10   :  { %v37_v7 = vadd.f32 %v36_v5, %v31_v3 }
  0x12   :  { %v40_v8 = vadd.f32 %v39_v6, %v37_v7 }
  0x14   :  { %v41_v9 = vmul.f32 0.5, %v40_v8 }
  0x16   :  { %54 = vtanh.f32 %v41_v9 }
  0x1c   :  { %v55_v10 = vpop.eup %54 }
  0x1d   :  { %v43_v11 = vmul.f32 0.5, %v55_v10 }
  0x1f   :  { %v44_v12 = vadd.f32 0.5, %v43_v11 }
  0x21   :  { %45 = vst [vmem:[%s109_s3] sm:$0xff] %v44_v12 }
  0x22   :  { %50 = vsyncpa [#allocation4], 1 }

</bundles_post_ra>
